<compile_context>
chip_gen: v7x
topology: tpu7x:2x2x1
jax: 0.10.0
libtpu: 0.0.40
codegen_flags: <defaults>
</compile_context>

<pallas_src>
import functools

import jax
import jax.numpy as jnp
import numpy as np
from jax.experimental import pallas as pl
from jax.experimental.pallas import tpu as pltpu


def _identity_copy_kernel(x_ref, o_ref):
    # Pure tile copy (the module defines no weights / no compute).
    o_ref[...] = x_ref[...]


def _sublane_multiple(dtype) -> int:
    # Sub-32-bit dtypes pack rows along sublanes: 8 for f32, 16 bf16, 32 int8.
    itemsize = jnp.dtype(dtype).itemsize
    return max(8, 32 // max(1, itemsize))


def _pick_cols(total: int):
    # Widest lane-dense column width (multiple of the 128-lane vreg) first.
    for c in (8192, 4096, 2048, 1024, 512, 256, 128):
        if total % c == 0:
            return c
    return None


@functools.lru_cache(maxsize=1)
def _device_tuning():
    """(tile_bytes, is_v7x) chosen per TPU generation."""
    try:
        kind = jax.devices()[0].device_kind.lower()
    except Exception:
        kind = ""
    is_v7 = any(tag in kind for tag in ("v7", "tpu7", "7x"))
    tile_bytes = (4 << 20) if is_v7 else (2 << 20)
    return tile_bytes, is_v7


def _pick_block_rows(rows, cols, dtype, tile_bytes, multi_step):
    itemsize = jnp.dtype(dtype).itemsize
    sub = _sublane_multiple(dtype)
    target = max(sub, tile_bytes // (cols * itemsize))
    if multi_step and rows >= 2 * sub:
        # Keep at least 2 grid steps so v7x's second TensorCore gets work.
        target = min(target, max(sub, (rows // 2 // sub) * sub))
    limit = min(target, rows)

    # Largest sublane-aligned exact divisor of `rows` not exceeding the target:
    best = 0
    d = sub
    while d <= limit:
        if rows % d == 0:
            best = d
        d += sub
    if best:
        return best
    if rows <= limit or rows < sub:
        return rows  # full extent along sublanes is always a legal block
    return (limit // sub) * sub  # ragged tail fallback; Pallas masks last tile


def _pallas_identity_copy_impl(x: jax.Array) -> jax.Array:
    orig_shape = x.shape
    total = x.size
    if total == 0:
        return x

    cols = _pick_cols(total)
    if cols is None:
        # Element count not a multiple of 128: identity is exact, skip copy.
        return x

    rows = total // cols
    itemsize = jnp.dtype(x.dtype).itemsize
    tile_bytes, is_v7 = _device_tuning()
    block_rows = _pick_block_rows(rows, cols, x.dtype, tile_bytes, is_v7)
    grid = (pl.cdiv(rows, block_rows),)

    # 2 double-buffered input tiles + 2 double-buffered output tiles.
    live_bytes = 4 * block_rows * cols * itemsize
    vmem_limit = (32 << 20) if live_bytes > (12 << 20) else None

    x2 = x.reshape(rows, cols)  # contiguous flatten: layout plumbing only
    y2 = pl.pallas_call(
        _identity_copy_kernel,
        out_shape=jax.ShapeDtypeStruct((rows, cols), x.dtype),
        grid=grid,
        in_specs=[pl.BlockSpec((block_rows, cols), lambda i: (i, 0))],
        out_specs=pl.BlockSpec((block_rows, cols), lambda i: (i, 0)),
        compiler_params=pltpu.CompilerParams(
            dimension_semantics=("parallel",),
            vmem_limit_bytes=vmem_limit,
        ),
    )(x2)
    return y2.reshape(orig_shape)


_pallas_identity_copy = jax.jit(_pallas_identity_copy_impl)


def block_forward(x: jax.Array, *, force_pallas_copy: bool = False) -> jax.Array:
    """Pallas equivalent of Block.forward(x) == x (identity).

    Default path returns x with zero HBM traffic and no kernel launch (the
    fastest possible implementation of an identity op on every generation).
    The tuned Pallas streaming copy is available behind force_pallas_copy for
    debugging / benchmarking only.
    """
    if not force_pallas_copy:
        return x
    return _pallas_identity_copy(x)


if __name__ == "__main__":
    key = jax.random.PRNGKey(0)
    # Small NCHW input consistent with a detection-backbone feature map.
    x = jax.random.normal(key, (2, 4, 16, 16), dtype=jnp.float32)
    x_host = np.asarray(jax.device_get(x))

    # Default (optimal) path: zero-cost identity.
    y_fast = jax.block_until_ready(block_forward(x))
    assert y_fast.shape == x_host.shape and y_fast.dtype == x.dtype
    assert np.array_equal(np.asarray(y_fast), x_host)

    # Debug path: exercise the Pallas streaming-copy kernel once.
    y_copy = jax.block_until_ready(block_forward(x, force_pallas_copy=True))
    assert y_copy.shape == x_host.shape and y_copy.dtype == x.dtype
    assert np.array_equal(np.asarray(y_copy), x_host)

    print("KERNEL_OK")
</pallas_src>

<mosaic_0001>
module attributes {stable_mosaic.version = 11 : i64} {
  func.func @_identity_copy_kernel(%arg0: i32, %arg1: memref<1x2048xf32, #tpu.memory_space<vmem>>, %arg2: memref<1x2048xf32, #tpu.memory_space<vmem>>) attributes {dimension_semantics = [#tpu.dimension_semantics<parallel>], iteration_bounds = array<i64: 1>, scalar_prefetch = 0 : i64, scratch_operands = 0 : i64, tpu.core_type = #tpu.core_type<tc>, window_params = [{transform_indices = @transform_0, window_bounds = array<i64: 1, 2048>}, {transform_indices = @transform_1, window_bounds = array<i64: 1, 2048>}]} {
    %c0 = arith.constant 0 : index
    %c0_0 = arith.constant 0 : index
    %0 = vector.load %arg1[%c0, %c0_0] : memref<1x2048xf32, #tpu.memory_space<vmem>>, vector<1x2048xf32>
    %c0_1 = arith.constant 0 : index
    %c0_2 = arith.constant 0 : index
    %1 = vector.load %arg2[%c0_1, %c0_2] : memref<1x2048xf32, #tpu.memory_space<vmem>>, vector<1x2048xf32>
    tpu.vector_store %arg2[%c0_1, %c0_2], %0 {strides = array<i32>} : memref<1x2048xf32, #tpu.memory_space<vmem>>, vector<1x2048xf32>,
    return
  }
  func.func @transform_0(%arg0: i32) -> (i32, i32) {
    %c0_i32 = arith.constant 0 : i32
    %c0_i32_0 = arith.constant 0 : i32
    return %arg0, %c0_i32 : i32, i32
  }
  func.func @transform_1(%arg0: i32) -> (i32, i32) {
    %c0_i32 = arith.constant 0 : i32
    %c0_i32_0 = arith.constant 0 : i32
    return %arg0, %c0_i32 : i32, i32
  }
}

</mosaic_0001>

<bundles_post_ra>
// kernel: _pallas_identity_copy_impl.1
= control target key start
LH: loop header
LB: loop body
LE: loop exit
PB: predicated region body
PF: predicated region fallthrough
CT: control target
= control target key end

     0   :  { %s38_s0 = inlined_call_operand.vmem [shape: f32[1,2048], index: 0, kind: input, shape index: {}]   ;;  %s39_s1 = inlined_call_operand.vmem [shape: f32[1,2048], index: 1, kind: output, shape index: {}]  }
   0x1   :  { %v8_v0 = vld [vmem:[%s38_s0] sm:$0xff]  ;;  %v9_v1 = vld [vmem:[%s38_s0 + $0x8] sm:$0xff] }
   0x2   :  { %10 = vst [vmem:[%s39_s1] sm:$0xff] %v8_v0  ;;  %11 = vst [vmem:[%s39_s1 + $0x8] sm:$0xff] %v9_v1 }

</bundles_post_ra>
